<compile_context>
chip_gen: v5e
topology: v5e:2x2
jax: 0.10.0
libtpu: 0.0.40
codegen_flags: <defaults>
</compile_context>

<pallas_src>
import jax
import jax.numpy as jnp
from jax.experimental import pallas as pl
from jax.experimental.pallas import tpu as pltpu


def subgcn_kernel(x_ref, s_ref, a_ref, p_ref,
                  w_sg_ref, b_sg_ref, g1_ref, be1_ref,
                  w_rel_ref, b_rel_ref, w_root_ref, g2_ref, be2_ref,
                  w_gat_ref, a_src_ref, a_dst_ref, b_gat_ref, g3_ref, be3_ref,
                  out_ref):
    f32 = jnp.float32
    bf16 = jnp.bfloat16
    eps = f32(1e-5)

    def mm(a, b):
        # bf16 MXU operands, f32 accumulation.
        return jnp.dot(a.astype(bf16), b.astype(bf16), preferred_element_type=f32)

    def bn(h, g, b):
        # BatchNorm1d forward (training): batch mean, biased variance, single pass.
        mu = jnp.mean(h, axis=0, keepdims=True)
        var = jnp.maximum(jnp.mean(h * h, axis=0, keepdims=True) - mu * mu, 0.0)
        return (h - mu) * jax.lax.rsqrt(var + eps) * g + b

    S = s_ref[...]                # (N, N) bf16, D^-1/2 (A+I) D^-1/2
    A = a_ref[...]                # (N, N) bf16, A[i, j] = 1 iff edge j -> i

    # ---------------- SGConv, K=3: relu(S^3 (x W) + b) ----------------
    # Project first (H <= 128 so the S-propagation MXU passes cost the same),
    # bias added after propagation so this equals S^3 x W + b.
    h = mm(x_ref[...], w_sg_ref[...])
    h = mm(S, h)
    h = mm(S, h)
    h = mm(S, h) + b_sg_ref[...]
    h1 = bn(jnp.maximum(h, 0.0), g1_ref[...], be1_ref[...])

    # ---------------- GraphConv: relu((A h1) W_rel + b_rel + h1 W_root) -------
    agg = mm(A, h1)
    h = mm(agg, w_rel_ref[...]) + b_rel_ref[...] + mm(h1, w_root_ref[...])
    h2 = bn(jnp.maximum(h, 0.0), g2_ref[...], be2_ref[...])

    # ---------------- GATConv (heads=1, self-loops added in-kernel) ----------
    wx = mm(h2, w_gat_ref[...])                                    # (N, H) f32
    # u_i = a_dst . Wx_i  (VPU row reduction)
    u = jnp.sum(wx * a_dst_ref[...], axis=1, keepdims=True)        # (N, 1)
    # v_j = a_src . Wx_j laid out along lanes: contract wx's last dim directly,
    # no materialized wx.T (avoids an (N,H) XLU transpose).
    v = jax.lax.dot_general(a_src_ref[...].astype(bf16), wx.astype(bf16),
                            dimension_numbers=(((1,), (1,)), ((), ())),
                            preferred_element_type=f32)            # (1, N)
    e = u + v                                                      # e[i, j]
    e = jnp.where(e > 0, e, 0.2 * e)                               # LeakyReLU(0.2)
    # Self-loop mask from S's support: S is nonzero exactly on A + I.
    e = jnp.where(S > 0, e, f32(-1e30))
    e = e - jnp.max(e, axis=1, keepdims=True)
    e = jnp.exp(e)                              # masked entries underflow to exactly 0
    denom = jnp.maximum(jnp.sum(e, axis=1, keepdims=True), f32(1e-30))
    inv = pl.reciprocal(denom, approx=True)                        # EUP, ~free
    h = mm(e * inv, wx) + b_gat_ref[...]                           # softmax @ Wx
    h3 = bn(jnp.maximum(h, 0.0), g3_ref[...], be3_ref[...])

    # ---------------- residual + (eval) dropout + global mean pool ----------
    out_ref[...] = mm(p_ref[...], h1 + h3)


def _vmem_limit_bytes(n, c, h):
    # Live N^2 working set after the mask/iota/where eliminations:
    # S, A (bf16), attention logits/weights in f32 + their bf16 MXU copy,
    # one boolean select temp, plus node-feature working set and slack.
    need = 2 * n * n * 2 + 3 * n * n * 4 + 24 * n * max(c, h) * 4 + (4 << 20)
    try:
        cap = int(pltpu.get_tpu_info().vmem_capacity_bytes)
    except Exception:
        cap = 64 << 20                      # conservative (v7x-sized) fallback
    # Leave headroom under the physical VMEM of the current generation:
    # v7x (64 MiB) -> ~48 MiB; v5e/v6e (128 MiB) -> up to ~110 MiB.
    ceiling = max(min(cap - (16 << 20), 110 << 20), 16 << 20)
    return int(min(max(need, 16 << 20), ceiling))


def subgcn_forward(x, S, A, P, params):
    B, N = P.shape
    C = x.shape[1]
    H = params["w_sg"].shape[1]
    args = (x,
            S.astype(jnp.bfloat16), A.astype(jnp.bfloat16), P.astype(jnp.bfloat16),
            params["w_sg"], params["b_sg"], params["g1"], params["be1"],
            params["w_rel"], params["b_rel"], params["w_root"], params["g2"], params["be2"],
            params["w_gat"], params["a_src"], params["a_dst"], params["b_gat"],
            params["g3"], params["be3"])
    vmem = lambda: pl.BlockSpec(memory_space=pltpu.MemorySpace.VMEM)
    return pl.pallas_call(
        subgcn_kernel,
        out_shape=jax.ShapeDtypeStruct((B, H), jnp.float32),
        in_specs=[vmem() for _ in args],
        out_specs=vmem(),
        compiler_params=pltpu.CompilerParams(
            vmem_limit_bytes=_vmem_limit_bytes(N, C, H)),
    )(*args)


if __name__ == "__main__":
    key = jax.random.PRNGKey(0)
    B, n_per, C, H = 2, 16, 8, 32          # 2 graphs of 16 nodes, c_in=8, hidden=32
    N = B * n_per

    # ---- deterministic undirected edge set: ring + chord inside each graph ----
    src_list, dst_list = [], []
    for g in range(B):
        off = g * n_per
        for i in range(n_per):
            for j in ((i + 1) % n_per, (i + 5) % n_per):
                src_list += [off + i, off + j]
                dst_list += [off + j, off + i]
    src = jnp.array(src_list, dtype=jnp.int32)
    dst = jnp.array(dst_list, dtype=jnp.int32)

    # dense adjacency: A[i, j] = 1  iff  edge j -> i  (messages aggregated at i)
    A = jnp.zeros((N, N), jnp.float32).at[dst, src].set(1.0)
    I = jnp.eye(N, dtype=jnp.float32)
    A_hat = A + I
    deg = jnp.sum(A_hat, axis=1)
    dinv = 1.0 / jnp.sqrt(deg)
    S = A_hat * dinv[:, None] * dinv[None, :]      # SGConv gcn_norm: D^-1/2 (A+I) D^-1/2

    # per-graph mean-pool matrix (B, N)
    batch = jnp.repeat(jnp.arange(B), n_per)
    P = (jnp.arange(B)[:, None] == batch[None, :]).astype(jnp.float32)
    P = P / jnp.sum(P, axis=1, keepdims=True)

    # ---- deterministic parameter init (PyTorch-style uniform / sqrt(fan_in)) ----
    keys = jax.random.split(key, 9)

    def init(k, shape, fan_in):
        return jax.random.uniform(k, shape, jnp.float32, -1.0, 1.0) / jnp.sqrt(float(fan_in))

    params = dict(
        w_sg=init(keys[0], (C, H), C),   b_sg=init(keys[1], (1, H), C),
        g1=jnp.ones((1, H), jnp.float32), be1=jnp.zeros((1, H), jnp.float32),
        w_rel=init(keys[2], (H, H), H),  b_rel=init(keys[3], (1, H), H),
        w_root=init(keys[4], (H, H), H),
        g2=jnp.ones((1, H), jnp.float32), be2=jnp.zeros((1, H), jnp.float32),
        w_gat=init(keys[5], (H, H), H),
        a_src=init(keys[6], (1, H), H),  a_dst=init(keys[7], (1, H), H),
        b_gat=jnp.zeros((1, H), jnp.float32),
        g3=jnp.ones((1, H), jnp.float32), be3=jnp.zeros((1, H), jnp.float32),
    )

    x = jax.random.normal(keys[8], (N, C), jnp.float32)

    out = subgcn_forward(x, S, A, P, params)
    jax.block_until_ready(out)
    assert out.shape == (B, H) and jnp.all(jnp.isfinite(out))
    print("KERNEL_OK")
</pallas_src>

<mosaic_0001>
module attributes {stable_mosaic.version = 11 : i64} {
  func.func @subgcn_kernel(%arg0: memref<32x8xf32, #tpu.memory_space<vmem>>, %arg1: memref<32x32xbf16, #tpu.memory_space<vmem>>, %arg2: memref<32x32xbf16, #tpu.memory_space<vmem>>, %arg3: memref<2x32xbf16, #tpu.memory_space<vmem>>, %arg4: memref<8x32xf32, #tpu.memory_space<vmem>>, %arg5: memref<1x32xf32, #tpu.memory_space<vmem>>, %arg6: memref<1x32xf32, #tpu.memory_space<vmem>>, %arg7: memref<1x32xf32, #tpu.memory_space<vmem>>, %arg8: memref<32x32xf32, #tpu.memory_space<vmem>>, %arg9: memref<1x32xf32, #tpu.memory_space<vmem>>, %arg10: memref<32x32xf32, #tpu.memory_space<vmem>>, %arg11: memref<1x32xf32, #tpu.memory_space<vmem>>, %arg12: memref<1x32xf32, #tpu.memory_space<vmem>>, %arg13: memref<32x32xf32, #tpu.memory_space<vmem>>, %arg14: memref<1x32xf32, #tpu.memory_space<vmem>>, %arg15: memref<1x32xf32, #tpu.memory_space<vmem>>, %arg16: memref<1x32xf32, #tpu.memory_space<vmem>>, %arg17: memref<1x32xf32, #tpu.memory_space<vmem>>, %arg18: memref<1x32xf32, #tpu.memory_space<vmem>>, %arg19: memref<2x32xf32, #tpu.memory_space<vmem>>) attributes {dimension_semantics = [], scalar_prefetch = 0 : i64, scratch_operands = 0 : i64, tpu.core_type = #tpu.core_type<tc>} {
    %c0 = arith.constant 0 : index
    %c0_0 = arith.constant 0 : index
    %0 = vector.load %arg1[%c0, %c0_0] : memref<32x32xbf16, #tpu.memory_space<vmem>>, vector<32x32xbf16>
    %c0_1 = arith.constant 0 : index
    %c0_2 = arith.constant 0 : index
    %1 = vector.load %arg2[%c0_1, %c0_2] : memref<32x32xbf16, #tpu.memory_space<vmem>>, vector<32x32xbf16>
    %c0_3 = arith.constant 0 : index
    %c0_4 = arith.constant 0 : index
    %2 = vector.load %arg0[%c0_3, %c0_4] : memref<32x8xf32, #tpu.memory_space<vmem>>, vector<32x8xf32>
    %c0_5 = arith.constant 0 : index
    %c0_6 = arith.constant 0 : index
    %3 = vector.load %arg4[%c0_5, %c0_6] : memref<8x32xf32, #tpu.memory_space<vmem>>, vector<8x32xf32>
    %4 = arith.truncf %2 : vector<32x8xf32> to vector<32x8xbf16>
    %5 = arith.truncf %3 : vector<8x32xf32> to vector<8x32xbf16>
    %cst = arith.constant dense<0.000000e+00> : vector<32x32xf32>
    %6 = tpu.matmul %4, %5, %cst {dimension_numbers = #tpu.dot_dimension_numbers<[1], [0], [0], [1], [0, 0, 1, 1], [], []>} : vector<32x8xbf16>, vector<8x32xbf16>, vector<32x32xf32> -> vector<32x32xf32>
    %7 = arith.truncf %6 : vector<32x32xf32> to vector<32x32xbf16>
    %cst_7 = arith.constant dense<0.000000e+00> : vector<32x32xf32>
    %8 = tpu.matmul %0, %7, %cst_7 {dimension_numbers = #tpu.dot_dimension_numbers<[1], [0], [0], [1], [0, 0, 1, 1], [], []>} : vector<32x32xbf16>, vector<32x32xbf16>, vector<32x32xf32> -> vector<32x32xf32>
    %9 = arith.truncf %8 : vector<32x32xf32> to vector<32x32xbf16>
    %cst_8 = arith.constant dense<0.000000e+00> : vector<32x32xf32>
    %10 = tpu.matmul %0, %9, %cst_8 {dimension_numbers = #tpu.dot_dimension_numbers<[1], [0], [0], [1], [0, 0, 1, 1], [], []>} : vector<32x32xbf16>, vector<32x32xbf16>, vector<32x32xf32> -> vector<32x32xf32>
    %11 = arith.truncf %10 : vector<32x32xf32> to vector<32x32xbf16>
    %cst_9 = arith.constant dense<0.000000e+00> : vector<32x32xf32>
    %12 = tpu.matmul %0, %11, %cst_9 {dimension_numbers = #tpu.dot_dimension_numbers<[1], [0], [0], [1], [0, 0, 1, 1], [], []>} : vector<32x32xbf16>, vector<32x32xbf16>, vector<32x32xf32> -> vector<32x32xf32>
    %c0_10 = arith.constant 0 : index
    %c0_11 = arith.constant 0 : index
    %13 = vector.load %arg5[%c0_10, %c0_11] : memref<1x32xf32, #tpu.memory_space<vmem>>, vector<1x32xf32>
    %14 = vector.broadcast %13 : vector<1x32xf32> to vector<32x32xf32>
    %15 = arith.addf %12, %14 : vector<32x32xf32>
    %cst_12 = arith.constant 0.000000e+00 : f32
    %16 = vector.broadcast %cst_12 : f32 to vector<32x32xf32>
    %17 = arith.maximumf %15, %16 : vector<32x32xf32>
    %c0_13 = arith.constant 0 : index
    %c0_14 = arith.constant 0 : index
    %18 = vector.load %arg6[%c0_13, %c0_14] : memref<1x32xf32, #tpu.memory_space<vmem>>, vector<1x32xf32>
    %c0_15 = arith.constant 0 : index
    %c0_16 = arith.constant 0 : index
    %19 = vector.load %arg7[%c0_15, %c0_16] : memref<1x32xf32, #tpu.memory_space<vmem>>, vector<1x32xf32>
    %cst_17 = arith.constant dense<0.000000e+00> : vector<32xf32>
    %20 = vector.multi_reduction <add>, %17, %cst_17 [0] : vector<32x32xf32> to vector<32xf32>
    %21 = vector.shape_cast %20 : vector<32xf32> to vector<1x32xf32>
    %cst_18 = arith.constant 3.200000e+01 : f32
    %22 = vector.broadcast %cst_18 : f32 to vector<1x32xf32>
    %23 = arith.divf %21, %22 : vector<1x32xf32>
    %24 = arith.mulf %17, %17 : vector<32x32xf32>
    %cst_19 = arith.constant dense<0.000000e+00> : vector<32xf32>
    %25 = vector.multi_reduction <add>, %24, %cst_19 [0] : vector<32x32xf32> to vector<32xf32>
    %26 = vector.shape_cast %25 : vector<32xf32> to vector<1x32xf32>
    %cst_20 = arith.constant 3.200000e+01 : f32
    %27 = vector.broadcast %cst_20 : f32 to vector<1x32xf32>
    %28 = arith.divf %26, %27 : vector<1x32xf32>
    %29 = arith.mulf %23, %23 : vector<1x32xf32>
    %30 = arith.subf %28, %29 : vector<1x32xf32>
    %cst_21 = arith.constant 0.000000e+00 : f32
    %31 = vector.broadcast %cst_21 : f32 to vector<1x32xf32>
    %32 = arith.maximumf %30, %31 : vector<1x32xf32>
    %33 = vector.broadcast %23 : vector<1x32xf32> to vector<32x32xf32>
    %34 = arith.subf %17, %33 : vector<32x32xf32>
    %cst_22 = arith.constant 9.99999974E-6 : f32
    %35 = vector.broadcast %cst_22 : f32 to vector<1x32xf32>
    %36 = arith.addf %32, %35 : vector<1x32xf32>
    %37 = math.rsqrt %36 : vector<1x32xf32>
    %38 = vector.broadcast %37 : vector<1x32xf32> to vector<32x32xf32>
    %39 = arith.mulf %34, %38 : vector<32x32xf32>
    %40 = vector.broadcast %18 : vector<1x32xf32> to vector<32x32xf32>
    %41 = arith.mulf %39, %40 : vector<32x32xf32>
    %42 = vector.broadcast %19 : vector<1x32xf32> to vector<32x32xf32>
    %43 = arith.addf %41, %42 : vector<32x32xf32>
    %44 = arith.truncf %43 : vector<32x32xf32> to vector<32x32xbf16>
    %cst_23 = arith.constant dense<0.000000e+00> : vector<32x32xf32>
    %45 = tpu.matmul %1, %44, %cst_23 {dimension_numbers = #tpu.dot_dimension_numbers<[1], [0], [0], [1], [0, 0, 1, 1], [], []>} : vector<32x32xbf16>, vector<32x32xbf16>, vector<32x32xf32> -> vector<32x32xf32>
    %c0_24 = arith.constant 0 : index
    %c0_25 = arith.constant 0 : index
    %46 = vector.load %arg8[%c0_24, %c0_25] : memref<32x32xf32, #tpu.memory_space<vmem>>, vector<32x32xf32>
    %47 = arith.truncf %45 : vector<32x32xf32> to vector<32x32xbf16>
    %48 = arith.truncf %46 : vector<32x32xf32> to vector<32x32xbf16>
    %cst_26 = arith.constant dense<0.000000e+00> : vector<32x32xf32>
    %49 = tpu.matmul %47, %48, %cst_26 {dimension_numbers = #tpu.dot_dimension_numbers<[1], [0], [0], [1], [0, 0, 1, 1], [], []>} : vector<32x32xbf16>, vector<32x32xbf16>, vector<32x32xf32> -> vector<32x32xf32>
    %c0_27 = arith.constant 0 : index
    %c0_28 = arith.constant 0 : index
    %50 = vector.load %arg9[%c0_27, %c0_28] : memref<1x32xf32, #tpu.memory_space<vmem>>, vector<1x32xf32>
    %51 = vector.broadcast %50 : vector<1x32xf32> to vector<32x32xf32>
    %52 = arith.addf %49, %51 : vector<32x32xf32>
    %c0_29 = arith.constant 0 : index
    %c0_30 = arith.constant 0 : index
    %53 = vector.load %arg10[%c0_29, %c0_30] : memref<32x32xf32, #tpu.memory_space<vmem>>, vector<32x32xf32>
    %54 = arith.truncf %43 : vector<32x32xf32> to vector<32x32xbf16>
    %55 = arith.truncf %53 : vector<32x32xf32> to vector<32x32xbf16>
    %cst_31 = arith.constant dense<0.000000e+00> : vector<32x32xf32>
    %56 = tpu.matmul %54, %55, %cst_31 {dimension_numbers = #tpu.dot_dimension_numbers<[1], [0], [0], [1], [0, 0, 1, 1], [], []>} : vector<32x32xbf16>, vector<32x32xbf16>, vector<32x32xf32> -> vector<32x32xf32>
    %57 = arith.addf %52, %56 : vector<32x32xf32>
    %cst_32 = arith.constant 0.000000e+00 : f32
    %58 = vector.broadcast %cst_32 : f32 to vector<32x32xf32>
    %59 = arith.maximumf %57, %58 : vector<32x32xf32>
    %c0_33 = arith.constant 0 : index
    %c0_34 = arith.constant 0 : index
    %60 = vector.load %arg11[%c0_33, %c0_34] : memref<1x32xf32, #tpu.memory_space<vmem>>, vector<1x32xf32>
    %c0_35 = arith.constant 0 : index
    %c0_36 = arith.constant 0 : index
    %61 = vector.load %arg12[%c0_35, %c0_36] : memref<1x32xf32, #tpu.memory_space<vmem>>, vector<1x32xf32>
    %cst_37 = arith.constant dense<0.000000e+00> : vector<32xf32>
    %62 = vector.multi_reduction <add>, %59, %cst_37 [0] : vector<32x32xf32> to vector<32xf32>
    %63 = vector.shape_cast %62 : vector<32xf32> to vector<1x32xf32>
    %cst_38 = arith.constant 3.200000e+01 : f32
    %64 = vector.broadcast %cst_38 : f32 to vector<1x32xf32>
    %65 = arith.divf %63, %64 : vector<1x32xf32>
    %66 = arith.mulf %59, %59 : vector<32x32xf32>
    %cst_39 = arith.constant dense<0.000000e+00> : vector<32xf32>
    %67 = vector.multi_reduction <add>, %66, %cst_39 [0] : vector<32x32xf32> to vector<32xf32>
    %68 = vector.shape_cast %67 : vector<32xf32> to vector<1x32xf32>
    %cst_40 = arith.constant 3.200000e+01 : f32
    %69 = vector.broadcast %cst_40 : f32 to vector<1x32xf32>
    %70 = arith.divf %68, %69 : vector<1x32xf32>
    %71 = arith.mulf %65, %65 : vector<1x32xf32>
    %72 = arith.subf %70, %71 : vector<1x32xf32>
    %cst_41 = arith.constant 0.000000e+00 : f32
    %73 = vector.broadcast %cst_41 : f32 to vector<1x32xf32>
    %74 = arith.maximumf %72, %73 : vector<1x32xf32>
    %75 = vector.broadcast %65 : vector<1x32xf32> to vector<32x32xf32>
    %76 = arith.subf %59, %75 : vector<32x32xf32>
    %cst_42 = arith.constant 9.99999974E-6 : f32
    %77 = vector.broadcast %cst_42 : f32 to vector<1x32xf32>
    %78 = arith.addf %74, %77 : vector<1x32xf32>
    %79 = math.rsqrt %78 : vector<1x32xf32>
    %80 = vector.broadcast %79 : vector<1x32xf32> to vector<32x32xf32>
    %81 = arith.mulf %76, %80 : vector<32x32xf32>
    %82 = vector.broadcast %60 : vector<1x32xf32> to vector<32x32xf32>
    %83 = arith.mulf %81, %82 : vector<32x32xf32>
    %84 = vector.broadcast %61 : vector<1x32xf32> to vector<32x32xf32>
    %85 = arith.addf %83, %84 : vector<32x32xf32>
    %c0_43 = arith.constant 0 : index
    %c0_44 = arith.constant 0 : index
    %86 = vector.load %arg13[%c0_43, %c0_44] : memref<32x32xf32, #tpu.memory_space<vmem>>, vector<32x32xf32>
    %87 = arith.truncf %85 : vector<32x32xf32> to vector<32x32xbf16>
    %88 = arith.truncf %86 : vector<32x32xf32> to vector<32x32xbf16>
    %cst_45 = arith.constant dense<0.000000e+00> : vector<32x32xf32>
    %89 = tpu.matmul %87, %88, %cst_45 {dimension_numbers = #tpu.dot_dimension_numbers<[1], [0], [0], [1], [0, 0, 1, 1], [], []>} : vector<32x32xbf16>, vector<32x32xbf16>, vector<32x32xf32> -> vector<32x32xf32>
    %c0_46 = arith.constant 0 : index
    %c0_47 = arith.constant 0 : index
    %90 = vector.load %arg15[%c0_46, %c0_47] : memref<1x32xf32, #tpu.memory_space<vmem>>, vector<1x32xf32>
    %91 = vector.broadcast %90 : vector<1x32xf32> to vector<32x32xf32>
    %92 = arith.mulf %89, %91 : vector<32x32xf32>
    %cst_48 = arith.constant dense<0.000000e+00> : vector<32xf32>
    %93 = vector.multi_reduction <add>, %92, %cst_48 [1] : vector<32x32xf32> to vector<32xf32>
    %94 = vector.shape_cast %93 : vector<32xf32> to vector<32x1xf32>
    %c0_49 = arith.constant 0 : index
    %c0_50 = arith.constant 0 : index
    %95 = vector.load %arg14[%c0_49, %c0_50] : memref<1x32xf32, #tpu.memory_space<vmem>>, vector<1x32xf32>
    %96 = arith.truncf %95 : vector<1x32xf32> to vector<1x32xbf16>
    %97 = arith.truncf %89 : vector<32x32xf32> to vector<32x32xbf16>
    %cst_51 = arith.constant dense<0.000000e+00> : vector<1x32xf32>
    %98 = tpu.matmul %96, %97, %cst_51 {dimension_numbers = #tpu.dot_dimension_numbers<[1], [1], [0], [0], [0, 0, 1, 0], [], []>} : vector<1x32xbf16>, vector<32x32xbf16>, vector<1x32xf32> -> vector<1x32xf32>
    %99 = vector.broadcast %94 : vector<32x1xf32> to vector<32x32xf32>
    %100 = vector.broadcast %98 : vector<1x32xf32> to vector<32x32xf32>
    %101 = arith.addf %99, %100 : vector<32x32xf32>
    %cst_52 = arith.constant 0.000000e+00 : f32
    %102 = vector.broadcast %cst_52 : f32 to vector<32x32xf32>
    %103 = arith.cmpf ogt, %101, %102 : vector<32x32xf32>
    %cst_53 = arith.constant 2.000000e-01 : f32
    %104 = vector.broadcast %cst_53 : f32 to vector<32x32xf32>
    %105 = arith.mulf %104, %101 : vector<32x32xf32>
    %106 = arith.select %103, %101, %105 : vector<32x32xi1>, vector<32x32xf32>
    %cst_54 = arith.constant 0.000000e+00 : bf16
    %107 = vector.broadcast %cst_54 : bf16 to vector<32x32xbf16>
    %108 = arith.cmpf ogt, %0, %107 : vector<32x32xbf16>
    %cst_55 = arith.constant -1.000000e+30 : f32
    %109 = vector.broadcast %cst_55 : f32 to vector<32x32xf32>
    %110 = arith.select %108, %106, %109 : vector<32x32xi1>, vector<32x32xf32>
    %cst_56 = arith.constant dense<0xFF800000> : vector<32xf32>
    %111 = vector.multi_reduction <maximumf>, %110, %cst_56 [1] : vector<32x32xf32> to vector<32xf32>
    %112 = vector.shape_cast %111 : vector<32xf32> to vector<32x1xf32>
    %113 = vector.broadcast %112 : vector<32x1xf32> to vector<32x32xf32>
    %114 = arith.subf %110, %113 : vector<32x32xf32>
    %115 = math.exp %114 : vector<32x32xf32>
    %cst_57 = arith.constant dense<0.000000e+00> : vector<32xf32>
    %116 = vector.multi_reduction <add>, %115, %cst_57 [1] : vector<32x32xf32> to vector<32xf32>
    %117 = vector.shape_cast %116 : vector<32xf32> to vector<32x1xf32>
    %cst_58 = arith.constant 1.000000e-30 : f32
    %118 = vector.broadcast %cst_58 : f32 to vector<32x1xf32>
    %119 = arith.maximumf %117, %118 : vector<32x1xf32>
    %120 = tpu.reciprocal %119 {approx = true} : vector<32x1xf32> -> vector<32x1xf32>
    %121 = vector.broadcast %120 : vector<32x1xf32> to vector<32x32xf32>
    %122 = arith.mulf %115, %121 : vector<32x32xf32>
    %123 = arith.truncf %122 : vector<32x32xf32> to vector<32x32xbf16>
    %124 = arith.truncf %89 : vector<32x32xf32> to vector<32x32xbf16>
    %cst_59 = arith.constant dense<0.000000e+00> : vector<32x32xf32>
    %125 = tpu.matmul %123, %124, %cst_59 {dimension_numbers = #tpu.dot_dimension_numbers<[1], [0], [0], [1], [0, 0, 1, 1], [], []>} : vector<32x32xbf16>, vector<32x32xbf16>, vector<32x32xf32> -> vector<32x32xf32>
    %c0_60 = arith.constant 0 : index
    %c0_61 = arith.constant 0 : index
    %126 = vector.load %arg16[%c0_60, %c0_61] : memref<1x32xf32, #tpu.memory_space<vmem>>, vector<1x32xf32>
    %127 = vector.broadcast %126 : vector<1x32xf32> to vector<32x32xf32>
    %128 = arith.addf %125, %127 : vector<32x32xf32>
    %cst_62 = arith.constant 0.000000e+00 : f32
    %129 = vector.broadcast %cst_62 : f32 to vector<32x32xf32>
    %130 = arith.maximumf %128, %129 : vector<32x32xf32>
    %c0_63 = arith.constant 0 : index
    %c0_64 = arith.constant 0 : index
    %131 = vector.load %arg17[%c0_63, %c0_64] : memref<1x32xf32, #tpu.memory_space<vmem>>, vector<1x32xf32>
    %c0_65 = arith.constant 0 : index
    %c0_66 = arith.constant 0 : index
    %132 = vector.load %arg18[%c0_65, %c0_66] : memref<1x32xf32, #tpu.memory_space<vmem>>, vector<1x32xf32>
    %cst_67 = arith.constant dense<0.000000e+00> : vector<32xf32>
    %133 = vector.multi_reduction <add>, %130, %cst_67 [0] : vector<32x32xf32> to vector<32xf32>
    %134 = vector.shape_cast %133 : vector<32xf32> to vector<1x32xf32>
    %cst_68 = arith.constant 3.200000e+01 : f32
    %135 = vector.broadcast %cst_68 : f32 to vector<1x32xf32>
    %136 = arith.divf %134, %135 : vector<1x32xf32>
    %137 = arith.mulf %130, %130 : vector<32x32xf32>
    %cst_69 = arith.constant dense<0.000000e+00> : vector<32xf32>
    %138 = vector.multi_reduction <add>, %137, %cst_69 [0] : vector<32x32xf32> to vector<32xf32>
    %139 = vector.shape_cast %138 : vector<32xf32> to vector<1x32xf32>
    %cst_70 = arith.constant 3.200000e+01 : f32
    %140 = vector.broadcast %cst_70 : f32 to vector<1x32xf32>
    %141 = arith.divf %139, %140 : vector<1x32xf32>
    %142 = arith.mulf %136, %136 : vector<1x32xf32>
    %143 = arith.subf %141, %142 : vector<1x32xf32>
    %cst_71 = arith.constant 0.000000e+00 : f32
    %144 = vector.broadcast %cst_71 : f32 to vector<1x32xf32>
    %145 = arith.maximumf %143, %144 : vector<1x32xf32>
    %146 = vector.broadcast %136 : vector<1x32xf32> to vector<32x32xf32>
    %147 = arith.subf %130, %146 : vector<32x32xf32>
    %cst_72 = arith.constant 9.99999974E-6 : f32
    %148 = vector.broadcast %cst_72 : f32 to vector<1x32xf32>
    %149 = arith.addf %145, %148 : vector<1x32xf32>
    %150 = math.rsqrt %149 : vector<1x32xf32>
    %151 = vector.broadcast %150 : vector<1x32xf32> to vector<32x32xf32>
    %152 = arith.mulf %147, %151 : vector<32x32xf32>
    %153 = vector.broadcast %131 : vector<1x32xf32> to vector<32x32xf32>
    %154 = arith.mulf %152, %153 : vector<32x32xf32>
    %155 = vector.broadcast %132 : vector<1x32xf32> to vector<32x32xf32>
    %156 = arith.addf %154, %155 : vector<32x32xf32>
    %c0_73 = arith.constant 0 : index
    %c0_74 = arith.constant 0 : index
    %157 = vector.load %arg3[%c0_73, %c0_74] : memref<2x32xbf16, #tpu.memory_space<vmem>>, vector<2x32xbf16>
    %158 = arith.addf %43, %156 : vector<32x32xf32>
    %159 = arith.truncf %158 : vector<32x32xf32> to vector<32x32xbf16>
    %cst_75 = arith.constant dense<0.000000e+00> : vector<2x32xf32>
    %160 = tpu.matmul %157, %159, %cst_75 {dimension_numbers = #tpu.dot_dimension_numbers<[1], [0], [0], [1], [0, 0, 1, 1], [], []>} : vector<2x32xbf16>, vector<32x32xbf16>, vector<2x32xf32> -> vector<2x32xf32>
    %c0_76 = arith.constant 0 : index
    %c0_77 = arith.constant 0 : index
    %161 = vector.load %arg19[%c0_76, %c0_77] : memref<2x32xf32, #tpu.memory_space<vmem>>, vector<2x32xf32>
    tpu.vector_store %arg19[%c0_76, %c0_77], %160 {strides = array<i32>} : memref<2x32xf32, #tpu.memory_space<vmem>>, vector<2x32xf32>,
    return
  }
}

</mosaic_0001>

<bundles_post_ra>
// kernel: tpu_custom_call.1
= control target key start
LH: loop header
LB: loop body
LE: loop exit
PB: predicated region body
PF: predicated region fallthrough
CT: control target
= control target key end

     0   :  { %s1350_s0 = inlined_call_operand.vmem [shape: f32[32,8], index: 0, kind: input, shape index: {}]   ;;  %s1351_s1 = inlined_call_operand.hbm [shape: bf16[32,32], index: 1, kind: input, shape index: {}]   ;;  %s1352_s2 = inlined_call_operand.hbm [shape: bf16[32,32], index: 2, kind: input, shape index: {}]   ;;  %s1353_s3 = inlined_call_operand.vmem [shape: bf16[2,32], index: 3, kind: input, shape index: {}]   ;;  %s1354_s4 = inlined_call_operand.vmem [shape: f32[8,32], index: 4, kind: input, shape index: {}]   ;;  %s1355_s5 = inlined_call_operand.vmem [shape: f32[1,32], index: 5, kind: input, shape index: {}]   ;;  %s1356_s6 = inlined_call_operand.vmem [shape: f32[1,32], index: 6, kind: input, shape index: {}]   ;;  %s1357_s7 = inlined_call_operand.vmem [shape: f32[1,32], index: 7, kind: input, shape index: {}]   ;;  %s1358_s8 = inlined_call_operand.vmem [shape: f32[32,32], index: 8, kind: input, shape index: {}]   ;;  %s1359_s9 = inlined_call_operand.vmem [shape: f32[1,32], index: 9, kind: input, shape index: {}]   ;;  %s1360_s10 = inlined_call_operand.hbm [shape: f32[32,32], index: 10, kind: input, shape index: {}]   ;;  %s1361_s11 = inlined_call_operand.vmem [shape: f32[1,32], index: 11, kind: input, shape index: {}]   ;;  %s1362_s12 = inlined_call_operand.vmem [shape: f32[1,32], index: 12, kind: input, shape index: {}]   ;;  %s1363_s13 = inlined_call_operand.hbm [shape: f32[32,32], index: 13, kind: input, shape index: {}]   ;;  %s1364_s14 = inlined_call_operand.vmem [shape: f32[1,32], index: 14, kind: input, shape index: {}]   ;;  %s1365_s15 = inlined_call_operand.vmem [shape: f32[1,32], index: 15, kind: input, shape index: {}]   ;;  %s1366_s16 = inlined_call_operand.vmem [shape: f32[1,32], index: 16, kind: input, shape index: {}]   ;;  %s1367_s17 = inlined_call_operand.vmem [shape: f32[1,32], index: 17, kind: input, shape index: {}]   ;;  %s1368_s18 = inlined_call_operand.vmem [shape: f32[1,32], index: 18, kind: input, shape index: {}]   ;;  %s1369_s19 = inlined_call_operand.hbm [shape: f32[2,32], index: 19, kind: output, shape index: {}]  }
   0x1   :  { %1371 = sst [smem:[#allocation15_spill]] %s1350_s0 }
   0x2   :  { %1372 = sst [smem:[#allocation16_spill]] %s1351_s1 }
   0x3   :  { %1373 = sst [smem:[#allocation17_spill]] %s1352_s2 }
   0x4   :  { %1374 = sst [smem:[#allocation18_spill]] %s1353_s3 }
   0x5   :  { %1375 = sst [smem:[#allocation19_spill]] %s1368_s18 }
   0x6   :  { %1376 = sst [smem:[#allocation20_spill]] %s1369_s19 }
   0x7   :  { %24 = vsyncpa [#allocation3], 0 }
   0x8   :  { %25 = vsyncpa [#allocation6], 0 }
   0x9   :  { %26 = vsyncpa [#allocation9], 0 }
   0xa   :  { %27 = vsyncpa [#allocation4], 0  ;;  %s1377_s20 = sld [smem:[#allocation17_spill]]  ;;  %s1040_s1 = smov [#allocation5]  }
   0xb   :  { %s49_s22 = sshll.u32 %s1040_s1, 4  ;;  %s1378_s24 = sld [smem:[#allocation16_spill]]  ;;  %s50_s22 = int_to_ptr.vmem [resolvable:$true] %s49_s22 }
   0xc   :  { %s1041_s3 = smov 64   ;;  %s1042_s26 = smov 4  }
   0xd   :  { %s1043_s27 = smov [#allocation2]   ;;  %s74_s18 = sshll.u32 %s1360_s10, 4  ;;  %s75_s18 = int_to_ptr.hbm [resolvable:$true] %s74_s18 }
   0xe   :  { %s36_s28 = sshll.u32 %s1043_s27, 4  ;;  %s1044_s0 = smov [#allocation7]   ;;  %s37_s28 = int_to_ptr.vmem [resolvable:$true] %s36_s28 }
   0xf   :  { %s76_s30 = sshll.u32 %s1044_s0, 4  ;;  %s91_s2 = sshll.u32 %s1363_s13, 4  ;;  %s77_s30 = int_to_ptr.vmem [resolvable:$true] %s76_s30  ;;  %s92_s2 = int_to_ptr.hbm [resolvable:$true] %s91_s2 }
  0x10   :  { %s47_s21 = sshll.u32 %s1377_s20, 4  ;;  %s1045_s23 = smov 128   ;;  %s48_s21 = int_to_ptr.hbm [resolvable:$true] %s47_s21 }
  0x11   :  { %s34_s25 = sshll.u32 %s1378_s24, 4  ;;  %s1046_s24 = smov 8   ;;  %s35_s25 = int_to_ptr.hbm [resolvable:$true] %s34_s25 }
  0x12   :  { %55 = dma.hbm_to_vmem [thread:$0]  %s48_s21, 256, %s50_s22, [#allocation6], %s1041_s3, %s1041_s3, %s1042_s26  }
  0x13   :  { %42 = dma.hbm_to_vmem [thread:$0]  %s35_s25, 256, %s37_s28, [#allocation3], %s1041_s3, %s1041_s3, %s1042_s26  }
  0x14   :  { %82 = dma.hbm_to_vmem [thread:$0]  %s75_s18, 512, %s77_s30, [#allocation6], %s1045_s23, %s1045_s23, %s1046_s24  }
  0x15   :  { %s1047_s21 = smov [#allocation8]  }
  0x16   :  { %s93_s22 = sshll.u32 %s1047_s21, 4  ;;  %s94_s22 = int_to_ptr.vmem [resolvable:$true] %s93_s22 }
  0x17   :  { %99 = dma.hbm_to_vmem [thread:$0]  %s92_s2, 512, %s94_s22, [#allocation9], %s1045_s23, %s1045_s23, %s1046_s24  }
  0x18   :  { %1032 = dma.done.wait [#allocation3], 256  }
  0x19   :  { %1033 = vsyncadd [#allocation3], 4294967040 }
  0x1a   :  { %1034 = dma.done.wait [#allocation6], 768  }
  0x1b   :  { %1035 = vsyncadd [#allocation6], 4294966528 }
  0x1c   :  { %1036 = dma.done.wait [#allocation9], 512  }
  0x1d   :  { %1037 = vsyncadd [#allocation9], 4294966784  ;;  %v139_v0 = vld [vmem:[%s1354_s4] sm:$0xff]  ;;  %vm150_vm0 = vcmask 1043456   ;;  %s1379_s3 = sld [smem:[#allocation15_spill]]  ;;  %vm143_vm1 = vcmask 64512  }
  0x1e   :  { %v142_v3 = vpack.c.bf16 %v139_v0, %v139_v0  ;;  %v863_v15 = vld [vmem:[#allocation2 + $0x8] sm:$0xff]  ;;  %v862_v16 = vld [vmem:[#allocation2] sm:$0xff]  ;;  %vm185_vm2 = vcmask 261120   ;;  %v1048_v34 = vmov 32.0   ;;  %v414_v38 = vld [vmem:[#allocation7 + $0x10] sm:$0xff]  ;;  %s1380_s0 = sld [smem:[#allocation19_spill]] }
  0x1f   :  { %v878_v31 = vld [vmem:[%s1355_s5] ss:$0 sm:$0xff]  ;;  %888 = vrcp.f32 %v1048_v34  ;;  %v415_v39 = vld [vmem:[#allocation7 + $0x18] sm:$0xff]  ;;  %v413_v44 = vld [vmem:[#allocation7 + $0x8] sm:$0xff]  ;;  %s1381_s5 = sld [smem:[#allocation18_spill]]  ;;  %s1049_s20 = smov [#allocation10]  }
  0x20   :  { %v152_v4 = vsel %vm150_vm0, %v142_v3, 0  ;;  %v412_v40 = vld [vmem:[#allocation7] sm:$0xff]  ;;  %v417_v43 = vpack.c.bf16 %v415_v39, %v414_v38  ;;  %s812_s1 = sshll.u32 %s1049_s20, 4  ;;  %s813_s1 = int_to_ptr.vmem [resolvable:$true] %s812_s1 }
  0x21   :  { %161 = vmatpush.bf16.msra.mxu0 %v152_v4  ;;  %v416_v47 = vpack.c.bf16 %v413_v44, %v412_v40  ;;  %v880_v44 = vld [vmem:[%s1357_s7] ss:$0 sm:$0xff]  ;;  %s1382_s7 = sld [smem:[#allocation20_spill]] }
  0x23   :  { %v135_v1 = vld [vmem:[%s1379_s3] sm:$0xff]  ;;  %v136_v2 = vld [vmem:[%s1379_s3 + $0x8] sm:$0xff]  ;;  %v137_v6 = vld [vmem:[%s1379_s3 + $0x10] sm:$0xff] }
  0x24   :  { %v140_v5 = vpack.c.bf16 %v136_v2, %v135_v1  ;;  %v138_v7 = vld [vmem:[%s1379_s3 + $0x18] sm:$0xff] }
  0x25   :  { %v141_v8 = vpack.c.bf16 %v138_v7, %v137_v6  ;;  %v889_v45 = vpop.eup %888 }
  0x26   :  { %826 = vmatmul.msk.bf16.vlgmr.msra.gmra.mxu0 %vm143_vm1, %v140_v5  ;;  %v277_v52 = vmul.f32 32.0, %v889_v45  ;;  %vm281_vm3 = vweird.f32 %v889_v45 }
  0x27   :  { %s814_s23 = sshll.u32 %s1382_s7, 4  ;;  %s815_s23 = int_to_ptr.hbm [resolvable:$true] %s814_s23 }
  0x28   :  { %v278_v0 = vsub.f32 1.0, %v277_v52 }
  0x2a   :  { %v279_v7 = vmul.f32 %v889_v45, %v278_v0 }
  0x36   :  { %827 = vmatmul.msk.bf16.gmra.mxu0 %vm143_vm1, %v141_v8 }
  0xa3   :  { %v163_v9 = vpop.f32.mrf.mxu0 }
  0xab   :  { %v165_v10 = vpop.f32.mrf.mxu0 }
  0xac   :  { %v173_v14 = vpack.c.bf16 %v165_v10, %v163_v9 }
  0xb3   :  { %v168_v11 = vpop.f32.mrf.mxu0 }
  0xbb   :  { %v170_v12 = vpop.f32.mrf.mxu0 }
  0xbc   :  { %v174_v13 = vpack.c.bf16 %v170_v12, %v168_v11  ;;  %v280_v12 = vadd.f32 %v889_v45, %v279_v7 }
  0xbe   :  { %198 = vmatpush.bf16.msra.mxu1 %v174_v13  ;;  %866 = vmatpush.bf16.msra.mxu3 %v174_v13 }
  0xc2   :  { %199 = vmatpush.bf16.msra.mxu1 %v173_v14  ;;  %867 = vmatpush.bf16.msra.mxu3 %v173_v14 }
  0xc5   :  { %837 = vmatmul.msk.bf16.vlgmr.msra.gmra.mxu3 %vm185_vm2, %v863_v15  ;;  %836 = vmatmul.msk.bf16.vlgmr.msra.gmra.mxu1 %vm185_vm2, %v862_v16 }
 0x142   :  { %v201_v17 = vpop.f32.mrf.mxu1 }
 0x148   :  { %v206_v18 = vpop.f32.mrf.mxu3 }
 0x14a   :  { %v203_v21 = vpop.f32.mrf.mxu1 }
 0x14b   :  { %v211_v22 = vpack.c.bf16 %v203_v21, %v201_v17  ;;  %v1209_v17 = vsel %vm281_vm3, %v889_v45, %v280_v12 }
 0x150   :  { %v208_v19 = vpop.f32.mrf.mxu3 }
 0x151   :  { %v212_v20 = vpack.c.bf16 %v208_v19, %v206_v18 }
 0x153   :  { %219 = vmatpush.bf16.msra.mxu2 %v212_v20 }
 0x157   :  { %220 = vmatpush.bf16.msra.mxu2 %v211_v22 }
 0x15a   :  { %838 = vmatmul.msk.bf16.vlgmr.msra.gmra.mxu2 %vm185_vm2, %v862_v16 }
 0x15b   :  { %430 = vmatpush.bf16.msrb.mxu2 %v417_v43 }
 0x15f   :  { %431 = vmatpush.bf16.msrb.mxu2 %v416_v47 }
 0x16a   :  { %839 = vmatmul.msk.bf16.gmra.mxu2 %vm185_vm2, %v863_v15 }
 0x1dd   :  { %v222_v23 = vpop.f32.mrf.mxu2 }
 0x1e5   :  { %v224_v24 = vpop.f32.mrf.mxu2 }
 0x1e6   :  { %v232_v28 = vpack.c.bf16 %v224_v24, %v222_v23 }
 0x1ed   :  { %v227_v25 = vpop.f32.mrf.mxu2 }
 0x1f5   :  { %v229_v26 = vpop.f32.mrf.mxu2 }
 0x1f6   :  { %v233_v27 = vpack.c.bf16 %v229_v26, %v227_v25 }
 0x1f8   :  { %244 = vmatpush.bf16.msrb.mxu3 %v233_v27 }
 0x1fc   :  { %245 = vmatpush.bf16.msrb.mxu3 %v232_v28 }
 0x1ff   :  { %840 = vmatmul.msk.bf16.vlgmr.msrb.gmra.mxu3 %vm185_vm2, %v862_v16 }
 0x20f   :  { %841 = vmatmul.msk.bf16.gmra.mxu3 %vm185_vm2, %v863_v15 }
 0x282   :  { %v247_v29 = vpop.f32.mrf.mxu3 }
 0x283   :  { %v248_v33 = vadd.f32 %v878_v31, %v247_v29 }
 0x285   :  { %v1188_v41 = vmax.f32 %v248_v33, 0.0 }
 0x287   :  { %v284_v48 = vmul.f32 %v1188_v41, %v1188_v41  ;;  %v263_v53 = vsel %vm185_vm2, %v1188_v41, 0.0 }
 0x289   :  { %v288_v58 = vsel %vm185_vm2, %v284_v48, 0.0 }
 0x28a   :  { %v249_v30 = vpop.f32.mrf.mxu3 }
 0x28b   :  { %v250_v32 = vadd.f32 %v878_v31, %v249_v30 }
 0x28d   :  { %v1186_v36 = vmax.f32 %v250_v32, 0.0 }
 0x28f   :  { %v285_v46 = vmul.f32 %v1186_v36, %v1186_v36  ;;  %v264_v49 = vsel %vm185_vm2, %v1186_v36, 0.0 }
 0x290   :  { %v265_v57 = vadd.f32 %v264_v49, %v263_v53 }
 0x291   :  { %v289_v54 = vsel %vm185_vm2, %v285_v46, 0.0 }
 0x292   :  { %v252_v35 = vpop.f32.mrf.mxu3  ;;  %v290_v61 = vadd.f32 %v289_v54, %v288_v58  ;;  %v864_v54 = vld [vmem:[#allocation5] sm:$0xff] }
 0x293   :  { %v253_v37 = vadd.f32 %v878_v31, %v252_v35  ;;  %v879_v35 = vld [vmem:[%s1356_s6] ss:$0 sm:$0xff] }
 0x295   :  { %v1190_v42 = vmax.f32 %v253_v37, 0.0 }
 0x297   :  { %v286_v50 = vmul.f32 %v1190_v42, %v1190_v42  ;;  %v266_v55 = vsel %vm185_vm2, %v1190_v42, 0.0 }
 0x298   :  { %v267_v62 = vadd.f32 %v266_v55, %v265_v57  ;;  %v865_v55 = vld [vmem:[#allocation5 + $0x8] sm:$0xff] }
 0x299   :  { %v291_v59 = vsel %vm185_vm2, %v286_v50, 0.0  ;;  %v378_v57 = vld [vmem:[%s1358_s8 + $0x18] sm:$0xff] }
 0x29a   :  { %v254_v51 = vpop.f32.mrf.mxu3  ;;  %v292_v2 = vadd.f32 %v291_v59, %v290_v61  ;;  %v375_v59 = vld [vmem:[%s1358_s8] sm:$0xff] }
 0x29b   :  { %v255_v56 = vadd.f32 %v878_v31, %v254_v51 }
 0x29d   :  { %v260_v60 = vmax.f32 %v255_v56, 0.0  ;;  %v377_v56 = vld [vmem:[%s1358_s8 + $0x10] sm:$0xff] }
 0x29e   :  { %v382_v58 = vpack.c.bf16 %v378_v57, %v377_v56  ;;  %v524_v56 = vld [vmem:[#allocation8 + $0x18] sm:$0xff] }
 0x29f   :  { %v268_v63 = vsel %vm185_vm2, %v260_v60, 0.0  ;;  %v287_v1 = vmul.f32 %v260_v60, %v260_v60 }
 0x2a0   :  { %v269_v3 = vadd.f32 %v268_v63, %v267_v62  ;;  %399 = vmatpush.bf16.msrb.mxu1 %v382_v58 }
 0x2a1   :  { %v293_v4 = vsel %vm185_vm2, %v287_v1, 0.0 }
 0x2a2   :  { %v270_v5 = vrot.slane %v269_v3, 4  ;;  %v294_v6 = vadd.f32 %v293_v4, %v292_v2 }
 0x2a4   :  { %v271_v8 = vadd.f32 %v270_v5, %v269_v3  ;;  %v295_v9 = vrot.slane %v294_v6, 4 }
 0x2a6   :  { %v272_v10 = vrot.slane %v271_v8, 2  ;;  %v296_v11 = vadd.f32 %v295_v9, %v294_v6 }
 0x2a8   :  { %v273_v13 = vadd.f32 %v272_v10, %v271_v8  ;;  %v297_v14 = vrot.slane %v296_v11, 2  ;;  %v881_v8 = vld [vmem:[%s1359_s9] ss:$0 sm:$0xff] }
 0x2aa   :  { %v274_v15 = vrot.slane %v273_v13, 1  ;;  %v298_v16 = vadd.f32 %v297_v14, %v296_v11 }
 0x2ac   :  { %v275_v18 = vadd.f32 %v274_v15, %v273_v13  ;;  %v299_v19 = vrot.slane %v298_v16, 1 }
 0x2ae   :  { %v283_v20 = vmul.f32 %v1209_v17, %v275_v18  ;;  %v300_v21 = vadd.f32 %v299_v19, %v298_v16 }
 0x2b0   :  { %v301_v22 = vmul.f32 %v300_v21, %v1209_v17  ;;  %v302_v23 = vmul.f32 %v283_v20, %v283_v20  ;;  %v308_v33 = vsub.f32 %v260_v60, %v283_v20  ;;  %v307_v34 = vsub.f32 %v1190_v42, %v283_v20  ;;  %v376_v60 = vld [vmem:[%s1358_s8 + $0x8] sm:$0xff] }
 0x2b1   :  { %v305_v37 = vsub.f32 %v1188_v41, %v283_v20  ;;  %v306_v38 = vsub.f32 %v1186_v36, %v283_v20  ;;  %v381_v61 = vpack.c.bf16 %v376_v60, %v375_v59  ;;  %v521_v60 = vld [vmem:[#allocation8] sm:$0xff] }
 0x2b2   :  { %v303_v24 = vsub.f32 %v301_v22, %v302_v23 }
 0x2b3   :  { %400 = vmatpush.bf16.msrb.mxu1 %v381_v61  ;;  %v522_v61 = vld [vmem:[#allocation8 + $0x8] sm:$0xff] }
 0x2b4   :  { %v304_v25 = vmax.f32 %v303_v24, 0.0 }
 0x2b6   :  { %v309_v26 = vadd.f32 1e-05, %v304_v25 }
 0x2b8   :  { %890 = vrsqrt.f32 %v309_v26  ;;  %vm316_vm5 = vweird.f32 %v309_v26 }
 0x2be   :  { %v891_v27 = vpop.eup %890 }
 0x2bf   :  { %v311_v28 = vmul.f32 %v891_v27, %v309_v26  ;;  %vm317_vm4 = vweird.f32 %v891_v27 }
 0x2c0   :  { %vm318_vm6 = vmor %vm316_vm5, %vm317_vm4 }
 0x2c1   :  { %v312_v29 = vmul.f32 %v891_v27, %v311_v28 }
 0x2c3   :  { %v313_v30 = vmul.f32 0.5, %v312_v29 }
 0x2c5   :  { %v314_v31 = vsub.f32 1.5, %v313_v30 }
 0x2c7   :  { %v315_v32 = vmul.f32 %v891_v27, %v314_v31 }
 0x2c9   :  { %v319_v39 = vsel %vm318_vm6, %v891_v27, %v315_v32  ;;  %vm805_vm6 = vcmask 254976  }
 0x2ca   :  { %v322_v40 = vmul.f32 %v319_v39, %v307_v34  ;;  %v323_v43 = vmul.f32 %v319_v39, %v308_v33  ;;  %v320_v45 = vmul.f32 %v319_v39, %v305_v37  ;;  %v321_v46 = vmul.f32 %v319_v39, %v306_v38 }
 0x2cc   :  { %v329_v47 = vmul.f32 %v879_v35, %v322_v40  ;;  %v330_v42 = vmul.f32 %v879_v35, %v323_v43  ;;  %v327_v48 = vmul.f32 %v879_v35, %v320_v45  ;;  %v328_v49 = vmul.f32 %v879_v35, %v321_v46 }
 0x2ce   :  { %v1222_v50 = vadd.f32 %v880_v44, %v329_v47  ;;  %v1224_v51 = vadd.f32 %v880_v44, %v330_v42  ;;  %v1226_v41 = vadd.f32 %v880_v44, %v327_v48  ;;  %v1228_v36 = vadd.f32 %v880_v44, %v328_v49 }
 0x2d0   :  { %v339_v52 = vpack.c.bf16 %v1224_v51, %v1222_v50  ;;  %v338_v53 = vpack.c.bf16 %v1228_v36, %v1226_v41 }
 0x2d2   :  { %362 = vmatpush.bf16.msrb.mxu0 %v339_v52  ;;  %854 = vmatmul.msk.bf16.vlgmr.msrb.gmra.mxu2 %vm185_vm2, %v338_v53 }
 0x2d6   :  { %363 = vmatpush.bf16.msrb.mxu0 %v338_v53 }
 0x2d9   :  { %850 = vmatmul.msk.bf16.vlgmr.msrb.gmra.mxu0 %vm185_vm2, %v864_v54 }
 0x2e2   :  { %855 = vmatmul.msk.bf16.gmra.mxu2 %vm185_vm2, %v339_v52 }
 0x2e9   :  { %851 = vmatmul.msk.bf16.gmra.mxu0 %vm185_vm2, %v865_v55  ;;  %v523_v55 = vld [vmem:[#allocation8 + $0x10] sm:$0xff] }
 0x2ea   :  { %v528_v59 = vpack.c.bf16 %v524_v56, %v523_v55 }
 0x2ec   :  { %541 = vmatpush.bf16.msra.mxu3 %v528_v59 }
 0x355   :  { %v433_v4 = vpop.f32.mrf.mxu2 }
 0x356   :  { %v365_v62 = vpop.f32.mrf.mxu0 }
 0x35d   :  { %v435_v6 = vpop.f32.mrf.mxu2 }
 0x35e   :  { %v367_v63 = vpop.f32.mrf.mxu0 }
 0x35f   :  { %v379_v0 = vpack.c.bf16 %v367_v63, %v365_v62 }
 0x361   :  { %852 = vmatmul.msk.bf16.vlgmr.msrb.gmra.mxu1 %vm185_vm2, %v379_v0  ;;  %v527_v0 = vpack.c.bf16 %v522_v61, %v521_v60  ;;  %v129_v61 = vld [vmem:[#allocation2 + $0x8] sm:$0xff]  }
 0x363   :  { %542 = vmatpush.bf16.msra.mxu3 %v527_v0  ;;  %v619_v0 = vunpack.c.l.bf16 %v129_v61 }
 0x365   :  { %v438_v12 = vpop.f32.mrf.mxu2  ;;  %vm623_vm10 = vcmp.gt.f32.partialorder %v619_v0, 0.0 }
 0x366   :  { %v370_v1 = vpop.f32.mrf.mxu0 }
 0x36d   :  { %v440_v27 = vpop.f32.mrf.mxu2 }
 0x36e   :  { %v372_v2 = vpop.f32.mrf.mxu0 }
 0x36f   :  { %v380_v3 = vpack.c.bf16 %v372_v2, %v370_v1 }
 0x371   :  { %853 = vmatmul.msk.bf16.gmra.mxu1 %vm185_vm2, %v380_v3 }
 0x3de   :  { %v402_v5 = vpop.f32.mrf.mxu1 }
 0x3df   :  { %v403_v10 = vadd.f32 %v881_v8, %v402_v5 }
 0x3e1   :  { %v443_v14 = vadd.f32 %v433_v4, %v403_v10 }
 0x3e3   :  { %v1257_v19 = vmax.f32 %v443_v14, 0.0 }
 0x3e5   :  { %v467_v23 = vmul.f32 %v1257_v19, %v1257_v19  ;;  %v453_v28 = vsel %vm185_vm2, %v1257_v19, 0.0 }
 0x3e6   :  { %v404_v7 = vpop.f32.mrf.mxu1 }
 0x3e7   :  { %v405_v9 = vadd.f32 %v881_v8, %v404_v7  ;;  %v471_v33 = vsel %vm185_vm2, %v467_v23, 0.0 }
 0x3e9   :  { %v444_v11 = vadd.f32 %v435_v6, %v405_v9 }
 0x3eb   :  { %v1255_v16 = vmax.f32 %v444_v11, 0.0 }
 0x3ed   :  { %v468_v21 = vmul.f32 %v1255_v16, %v1255_v16  ;;  %v454_v24 = vsel %vm185_vm2, %v1255_v16, 0.0 }
 0x3ee   :  { %v407_v13 = vpop.f32.mrf.mxu1  ;;  %v455_v32 = vadd.f32 %v454_v24, %v453_v28  ;;  %v883_v24 = vld [vmem:[%s1362_s12] ss:$0 sm:$0xff] }
 0x3ef   :  { %v408_v15 = vadd.f32 %v881_v8, %v407_v13  ;;  %v472_v29 = vsel %vm185_vm2, %v468_v21, 0.0 }
 0x3f0   :  { %v473_v37 = vadd.f32 %v472_v29, %v471_v33 }
 0x3f1   :  { %v445_v18 = vadd.f32 %v438_v12, %v408_v15 }
 0x3f3   :  { %v1259_v20 = vmax.f32 %v445_v18, 0.0  ;;  %v882_v18 = vld [vmem:[%s1361_s11] ss:$0 sm:$0xff] }
 0x3f5   :  { %v469_v25 = vmul.f32 %v1259_v20, %v1259_v20  ;;  %v456_v30 = vsel %vm185_vm2, %v1259_v20, 0.0 }
 0x3f6   :  { %v409_v22 = vpop.f32.mrf.mxu1  ;;  %v457_v38 = vadd.f32 %v456_v30, %v455_v32 }
 0x3f7   :  { %v410_v26 = vadd.f32 %v881_v8, %v409_v22  ;;  %v474_v34 = vsel %vm185_vm2, %v469_v25, 0.0 }
 0x3f8   :  { %v475_v43 = vadd.f32 %v474_v34, %v473_v37 }
 0x3f9   :  { %v446_v31 = vadd.f32 %v440_v27, %v410_v26 }
 0x3fb   :  { %v450_v35 = vmax.f32 %v446_v31, 0.0 }
 0x3fd   :  { %v458_v39 = vsel %vm185_vm2, %v450_v35, 0.0  ;;  %v470_v40 = vmul.f32 %v450_v35, %v450_v35 }
 0x3fe   :  { %v459_v44 = vadd.f32 %v458_v39, %v457_v38  ;;  %v884_v39 = vld [vmem:[%s1365_s15] ss:$0 sm:$0xff] }
 0x3ff   :  { %v476_v45 = vsel %vm185_vm2, %v470_v40, 0.0 }
 0x400   :  { %v460_v46 = vrot.slane %v459_v44, 4  ;;  %v477_v47 = vadd.f32 %v476_v45, %v475_v43 }
 0x402   :  { %v461_v42 = vadd.f32 %v460_v46, %v459_v44  ;;  %v478_v48 = vrot.slane %v477_v47, 4 }
 0x404   :  { %v462_v49 = vrot.slane %v461_v42, 2  ;;  %v479_v52 = vadd.f32 %v478_v48, %v477_v47 }
 0x406   :  { %v463_v53 = vadd.f32 %v462_v49, %v461_v42  ;;  %v480_v54 = vrot.slane %v479_v52, 2 }
 0x408   :  { %v464_v57 = vrot.slane %v463_v53, 1  ;;  %v481_v58 = vadd.f32 %v480_v54, %v479_v52 }
 0x40a   :  { %v465_v62 = vadd.f32 %v464_v57, %v463_v53  ;;  %v482_v63 = vrot.slane %v481_v58, 1  ;;  %v574_v57 = vld [vmem:[%s1364_s14] sm:$0x1] }
 0x40c   :  { %v466_v1 = vmul.f32 %v465_v62, %v1209_v17  ;;  %v483_v2 = vadd.f32 %v482_v63, %v481_v58  ;;  %v575_v58 = vpack.c.bf16 %v574_v57, %v574_v57  ;;  %v127_v62 = vld [vmem:[#allocation2] sm:$0xff]  }
 0x40e   :  { %v484_v3 = vmul.f32 %v483_v2, %v1209_v17  ;;  %v485_v4 = vmul.f32 %v466_v1, %v466_v1  ;;  %v488_v14 = vsub.f32 %v1257_v19, %v466_v1  ;;  %v489_v15 = vsub.f32 %v1255_v16, %v466_v1 }
 0x40f   :  { %v491_v19 = vsub.f32 %v450_v35, %v466_v1  ;;  %v490_v16 = vsub.f32 %v1259_v20, %v466_v1  ;;  %v620_v1 = vunpack.c.h.bf16 %v129_v61 }
 0x410   :  { %v486_v5 = vsub.f32 %v484_v3, %v485_v4  ;;  %v617_v4 = vunpack.c.l.bf16 %v127_v62 }
 0x411   :  { %vm624_vm11 = vcmp.gt.f32.partialorder %v620_v1, 0.0 }
 0x412   :  { %v487_v6 = vmax.f32 %v486_v5, 0.0  ;;  %vm621_vm15 = vcmp.gt.f32.partialorder %v617_v4, 0.0 }
 0x414   :  { %v492_v7 = vadd.f32 1e-05, %v487_v6 }
 0x416   :  { %892 = vrsqrt.f32 %v492_v7  ;;  %vm499_vm8 = vweird.f32 %v492_v7 }
 0x41c   :  { %v893_v8 = vpop.eup %892 }
 0x41d   :  { %v494_v9 = vmul.f32 %v893_v8, %v492_v7  ;;  %vm500_vm7 = vweird.f32 %v893_v8 }
 0x41e   :  { %vm501_vm9 = vmor %vm499_vm8, %vm500_vm7 }
 0x41f   :  { %v495_v10 = vmul.f32 %v893_v8, %v494_v9 }
 0x421   :  { %v496_v11 = vmul.f32 0.5, %v495_v10 }
 0x423   :  { %v497_v12 = vsub.f32 1.5, %v496_v11 }
 0x425   :  { %v498_v13 = vmul.f32 %v893_v8, %v497_v12 }
 0x427   :  { %v502_v21 = vsel %vm501_vm9, %v893_v8, %v498_v13 }
 0x428   :  { %v503_v22 = vmul.f32 %v502_v21, %v488_v14  ;;  %v504_v23 = vmul.f32 %v502_v21, %v489_v15  ;;  %v506_v30 = vmul.f32 %v502_v21, %v491_v19  ;;  %v505_v31 = vmul.f32 %v502_v21, %v490_v16 }
 0x429   :  { %v618_v15 = vunpack.c.h.bf16 %v127_v62 }
 0x42a   :  { %v510_v25 = vmul.f32 %v882_v18, %v503_v22  ;;  %v511_v26 = vmul.f32 %v882_v18, %v504_v23  ;;  %v512_v32 = vmul.f32 %v882_v18, %v505_v31  ;;  %v513_v33 = vmul.f32 %v882_v18, %v506_v30 }
 0x42b   :  { %vm622_vm1 = vcmp.gt.f32.partialorder %v618_v15, 0.0 }
 0x42c   :  { %v517_v27 = vadd.f32 %v883_v24, %v510_v25  ;;  %v518_v28 = vadd.f32 %v883_v24, %v511_v26  ;;  %v519_v34 = vadd.f32 %v883_v24, %v512_v32  ;;  %v520_v37 = vadd.f32 %v883_v24, %v513_v33 }
 0x42e   :  { %v525_v29 = vpack.c.bf16 %v518_v28, %v517_v27  ;;  %v526_v38 = vpack.c.bf16 %v520_v37, %v519_v34 }
 0x430   :  { %856 = vmatmul.msk.bf16.vlgmr.msra.gmra.mxu3 %vm185_vm2, %v525_v29 }
 0x440   :  { %857 = vmatmul.msk.bf16.gmra.mxu3 %vm185_vm2, %v526_v38 }
 0x4b3   :  { %v544_v40 = vpop.f32.mrf.mxu3 }
 0x4b4   :  { %v558_v43 = vmul.f32 %v884_v39, %v544_v40 }
 0x4b6   :  { %v562_v35 = vsel %vm185_vm2, %v558_v43, 0.0 }
 0x4b7   :  { %563 = vadd.xlane.f32.xlu0 %v562_v35 }
 0x4bb   :  { %v546_v44 = vpop.f32.mrf.mxu3 }
 0x4bc   :  { %v559_v20 = vmul.f32 %v884_v39, %v546_v44  ;;  %v576_v55 = vpack.c.bf16 %v546_v44, %v544_v40 }
 0x4be   :  { %v565_v45 = vsel %vm185_vm2, %v559_v20, 0.0  ;;  %v582_v56 = vsel %vm185_vm2, %v576_v55, 0 }
 0x4bf   :  { %566 = vadd.xlane.f32.xlu0 %v565_v45 }
 0x4c3   :  { %v549_v46 = vpop.f32.mrf.mxu3 }
 0x4c4   :  { %v560_v47 = vmul.f32 %v884_v39, %v549_v46 }
 0x4c6   :  { %v568_v42 = vsel %vm185_vm2, %v560_v47, 0.0 }
 0x4c7   :  { %569 = vadd.xlane.f32.xlu1 %v568_v42 }
 0x4cb   :  { %v551_v48 = vpop.f32.mrf.mxu3 }
 0x4cc   :  { %v561_v49 = vmul.f32 %v884_v39, %v551_v48  ;;  %v577_v52 = vpack.c.bf16 %v551_v48, %v549_v46 }
 0x4ce   :  { %v585_v53 = vsel %vm185_vm2, %v577_v52, 0  ;;  %695 = vmatpush.bf16.msra.mxu1 %v577_v52  ;;  %v571_v54 = vsel %vm185_vm2, %v561_v49, 0.0 }
 0x4cf   :  { %593 = vmatpush.bf16.xpose.msra.mxu0 %v585_v53  ;;  %572 = vadd.xlane.f32.xlu1 %v571_v54 }
 0x4d2   :  { %696 = vmatpush.bf16.msra.mxu1 %v576_v55 }
 0x4d7   :  { %594 = vmatpush.bf16.xpose.msra.mxu0 %v582_v56 }
 0x4de   :  { %858 = vmatmul.msk.bf16.vlgmr.msra.gmra.mxu0 %vm185_vm2, %v575_v58 }
 0x52a   :  { %v564_v60 = vpop.xlane.xlu0 %563 }
 0x532   :  { %v567_v5 = vpop.xlane.xlu0 %566 }
 0x53a   :  { %v570_v59 = vpop.xlane.xlu1 %569 }
 0x542   :  { %v573_v3 = vpop.xlane.xlu1 %572 }
 0x55b   :  { %v596_v63 = vpop.f32.mrf.mxu0 }
 0x55c   :  { %v600_v2 = vperm.slane %v596_v63, 0 }
 0x55e   :  { %v603_v6 = vadd.f32 %v600_v2, %v570_v59  ;;  %v604_v7 = vadd.f32 %v600_v2, %v573_v3  ;;  %v601_v8 = vadd.f32 %v600_v2, %v564_v60  ;;  %v602_v9 = vadd.f32 %v600_v2, %v567_v5 }
 0x560   :  { %vm607_vm12 = vcmp.gt.f32.partialorder %v603_v6, 0.0  ;;  %v611_v10 = vmul.f32 0.2, %v603_v6  ;;  %vm608_vm13 = vcmp.gt.f32.partialorder %v604_v7, 0.0  ;;  %v612_v11 = vmul.f32 0.2, %v604_v7 }
 0x561   :  { %vm605_vm14 = vcmp.gt.f32.partialorder %v601_v8, 0.0  ;;  %v609_v12 = vmul.f32 0.2, %v601_v8  ;;  %v610_v24 = vmul.f32 0.2, %v602_v9  ;;  %vm606_vm0 = vcmp.gt.f32.partialorder %v602_v9, 0.0 }
 0x562   :  { %v615_v13 = vsel %vm607_vm12, %v603_v6, %v611_v10  ;;  %v616_v14 = vsel %vm608_vm13, %v604_v7, %v612_v11 }
 0x563   :  { %v598_v18 = vpop.f32.mrf.mxu0  ;;  %v627_v21 = vsel %vm623_vm10, %v615_v13, -1e+30  ;;  %v628_v22 = vsel %vm624_vm11, %v616_v14, -1e+30  ;;  %v613_v23 = vsel %vm605_vm14, %v601_v8, %v609_v12  ;;  %v614_v29 = vsel %vm606_vm0, %v602_v9, %v610_v24  ;;  %v885_v9 = vld [vmem:[%s1366_s16] ss:$0 sm:$0xff] }
 0x564   :  { %v635_v25 = vsel %vm185_vm2, %v627_v21, -inf  ;;  %v638_v26 = vsel %vm185_vm2, %v628_v22, -inf  ;;  %v625_v27 = vsel %vm621_vm15, %v613_v23, -1e+30  ;;  %v626_v19 = vsel %vm622_vm1, %v614_v29, -1e+30 }
 0x565   :  { %636 = vmax.xlane.f32.xlu0 %v635_v25  ;;  %639 = vmax.xlane.f32.xlu1 %v638_v26  ;;  %v629_v28 = vsel %vm185_vm2, %v625_v27, -inf  ;;  %v632_v16 = vsel %vm185_vm2, %v626_v19, -inf }
 0x566   :  { %630 = vmax.xlane.f32.xlu2 %v629_v28 }
 0x56e   :  { %633 = vmax.xlane.f32.xlu2 %v632_v16 }
 0x5d8   :  { %v637_v30 = vpop.xlane.xlu0 %636  ;;  %v640_v33 = vpop.xlane.xlu1 %639 }
 0x5d9   :  { %v643_v31 = vsub.f32 %v627_v21, %v637_v30  ;;  %v631_v32 = vpop.xlane.xlu2 %630  ;;  %v644_v39 = vsub.f32 %v628_v22, %v640_v33 }
 0x5da   :  { %v641_v34 = vsub.f32 %v625_v27, %v631_v32 }
 0x5db   :  { %v649_v37 = vmul.f32 1.442695, %v643_v31  ;;  %v651_v40 = vmul.f32 1.442695, %v644_v39 }
 0x5dc   :  { %v645_v38 = vmul.f32 1.442695, %v641_v34 }
 0x5dd   :  { %894 = vpow2.f32 %v649_v37 }
 0x5de   :  { %896 = vpow2.f32 %v645_v38 }
 0x5df   :  { %898 = vpow2.f32 %v651_v40 }
 0x5e1   :  { %v634_v43 = vpop.xlane.xlu2 %633 }
 0x5e2   :  { %v642_v35 = vsub.f32 %v626_v19, %v634_v43 }
 0x5e3   :  { %v895_v44 = vpop.eup %894 }
 0x5e4   :  { %v647_v20 = vmul.f32 1.442695, %v642_v35  ;;  %v659_v45 = vsel %vm185_vm2, %v895_v44, 0.0  ;;  %v897_v46 = vpop.eup %896 }
 0x5e5   :  { %660 = vadd.xlane.f32.xlu1 %v659_v45  ;;  %v653_v47 = vsel %vm185_vm2, %v897_v46, 0.0  ;;  %v899_v42 = vpop.eup %898 }
 0x5e6   :  { %900 = vpow2.f32 %v647_v20  ;;  %654 = vadd.xlane.f32.xlu2 %v653_v47  ;;  %v662_v52 = vsel %vm185_vm2, %v899_v42, 0.0 }
 0x5ec   :  { %v901_v48 = vpop.eup %900 }
 0x5ed   :  { %v656_v49 = vsel %vm185_vm2, %v901_v48, 0.0 }
 0x5ee   :  { %657 = vadd.xlane.f32.xlu0 %v656_v49  ;;  %663 = vadd.xlane.f32.xlu2 %v662_v52 }
 0x658   :  { %v661_v60 = vpop.xlane.xlu1 %660 }
 0x659   :  { %v655_v53 = vpop.xlane.xlu2 %654  ;;  %v667_v1 = vmax.f32 %v661_v60, 1e-30 }
 0x65a   :  { %v665_v54 = vmax.f32 %v655_v53, 1e-30 }
 0x65c   :  { %902 = vrcp.f32 %v665_v54 }
 0x661   :  { %v658_v55 = vpop.xlane.xlu0 %657  ;;  %v664_v58 = vpop.xlane.xlu2 %663 }
 0x662   :  { %v666_v56 = vmax.f32 %v658_v55, 1e-30  ;;  %v903_v57 = vpop.eup %902  ;;  %v668_v63 = vmax.f32 %v664_v58, 1e-30 }
 0x663   :  { %v673_v61 = vmul.f32 %v903_v57, %v897_v46 }
 0x664   :  { %904 = vrcp.f32 %v666_v56 }
 0x665   :  { %906 = vrcp.f32 %v668_v63 }
 0x666   :  { %908 = vrcp.f32 %v667_v1 }
 0x66a   :  { %v905_v59 = vpop.eup %904 }
 0x66b   :  { %v674_v62 = vmul.f32 %v905_v59, %v901_v48  ;;  %v907_v2 = vpop.eup %906 }
 0x66c   :  { %v909_v3 = vpop.eup %908  ;;  %v676_v4 = vmul.f32 %v907_v2, %v899_v42 }
 0x66d   :  { %v677_v0 = vpack.c.bf16 %v674_v62, %v673_v61  ;;  %v675_v5 = vmul.f32 %v909_v3, %v895_v44 }
 0x66f   :  { %859 = vmatmul.msk.bf16.vlgmr.msra.gmra.mxu1 %vm185_vm2, %v677_v0  ;;  %v678_v6 = vpack.c.bf16 %v676_v4, %v675_v5  ;;  %v886_v4 = vld [vmem:[%s1367_s17] ss:$0 sm:$0xff] }
 0x67f   :  { %860 = vmatmul.msk.bf16.gmra.mxu1 %vm185_vm2, %v678_v6 }
 0x6ec   :  { %v698_v7 = vpop.f32.mrf.mxu1 }
 0x6ed   :  { %v699_v11 = vadd.f32 %v885_v9, %v698_v7 }
 0x6ef   :  { %v708_v15 = vmax.f32 %v699_v11, 0.0 }
 0x6f1   :  { %v728_v22 = vmul.f32 %v708_v15, %v708_v15  ;;  %v714_v26 = vsel %vm185_vm2, %v708_v15, 0.0 }
 0x6f3   :  { %v732_v16 = vsel %vm185_vm2, %v728_v22, 0.0 }
 0x6f4   :  { %v700_v8 = vpop.f32.mrf.mxu1 }
 0x6f5   :  { %v701_v10 = vadd.f32 %v885_v9, %v700_v8 }
 0x6f7   :  { %v1317_v13 = vmax.f32 %v701_v10, 0.0  ;;  %v887_v10 = vld [vmem:[%s1380_s0] ss:$0 sm:$0xff] }
 0x6f9   :  { %v729_v21 = vmul.f32 %v1317_v13, %v1317_v13  ;;  %v715_v23 = vsel %vm185_vm2, %v1317_v13, 0.0 }
 0x6fa   :  { %v716_v19 = vadd.f32 %v715_v23, %v714_v26 }
 0x6fb   :  { %v733_v27 = vsel %vm185_vm2, %v729_v21, 0.0 }
 0x6fc   :  { %v703_v12 = vpop.f32.mrf.mxu1  ;;  %v734_v32 = vadd.f32 %v733_v27, %v732_v16  ;;  %v782_v16 = vld [vmem:[%s1381_s5] sm:$0x1] }
 0x6fd   :  { %v704_v14 = vadd.f32 %v885_v9, %v703_v12 }
 0x6ff   :  { %v710_v18 = vmax.f32 %v704_v14, 0.0 }
 0x701   :  { %v730_v24 = vmul.f32 %v710_v18, %v710_v18  ;;  %v717_v28 = vsel %vm185_vm2, %v710_v18, 0.0 }
 0x702   :  { %v718_v33 = vadd.f32 %v717_v28, %v716_v19 }
 0x703   :  { %v735_v30 = vsel %vm185_vm2, %v730_v24, 0.0 }
 0x704   :  { %v705_v25 = vpop.f32.mrf.mxu1  ;;  %v736_v38 = vadd.f32 %v735_v30, %v734_v32 }
 0x705   :  { %v706_v29 = vadd.f32 %v885_v9, %v705_v25 }
 0x707   :  { %v711_v31 = vmax.f32 %v706_v29, 0.0 }
 0x709   :  { %v719_v34 = vsel %vm185_vm2, %v711_v31, 0.0  ;;  %v731_v37 = vmul.f32 %v711_v31, %v711_v31 }
 0x70a   :  { %v720_v39 = vadd.f32 %v719_v34, %v718_v33 }
 0x70b   :  { %v737_v40 = vsel %vm185_vm2, %v731_v37, 0.0 }
 0x70c   :  { %v721_v43 = vrot.slane %v720_v39, 4  ;;  %v738_v35 = vadd.f32 %v737_v40, %v736_v38 }
 0x70e   :  { %v722_v44 = vadd.f32 %v721_v43, %v720_v39  ;;  %v739_v20 = vrot.slane %v738_v35, 4 }
 0x710   :  { %v723_v45 = vrot.slane %v722_v44, 2  ;;  %v740_v46 = vadd.f32 %v739_v20, %v738_v35 }
 0x712   :  { %v724_v47 = vadd.f32 %v723_v45, %v722_v44  ;;  %v741_v42 = vrot.slane %v740_v46, 2 }
 0x714   :  { %v725_v48 = vrot.slane %v724_v47, 1  ;;  %v742_v49 = vadd.f32 %v741_v42, %v740_v46 }
 0x716   :  { %v726_v52 = vadd.f32 %v725_v48, %v724_v47  ;;  %v743_v53 = vrot.slane %v742_v49, 1 }
 0x718   :  { %v727_v54 = vmul.f32 %v726_v52, %v1209_v17  ;;  %v744_v55 = vadd.f32 %v743_v53, %v742_v49 }
 0x71a   :  { %v745_v56 = vmul.f32 %v744_v55, %v1209_v17  ;;  %v746_v57 = vmul.f32 %v727_v54, %v727_v54  ;;  %v752_v3 = vsub.f32 %v711_v31, %v727_v54  ;;  %v751_v17 = vsub.f32 %v710_v18, %v727_v54 }
 0x71b   :  { %v749_v5 = vsub.f32 %v708_v15, %v727_v54  ;;  %v750_v6 = vsub.f32 %v1317_v13, %v727_v54 }
 0x71c   :  { %v747_v58 = vsub.f32 %v745_v56, %v746_v57 }
 0x71e   :  { %v748_v59 = vmax.f32 %v747_v58, 0.0 }
 0x720   :  { %v753_v60 = vadd.f32 1e-05, %v748_v59 }
 0x722   :  { %910 = vrsqrt.f32 %v753_v60  ;;  %vm760_vm4 = vweird.f32 %v753_v60 }
 0x728   :  { %v911_v61 = vpop.eup %910 }
 0x729   :  { %v755_v62 = vmul.f32 %v911_v61, %v753_v60  ;;  %vm761_vm3 = vweird.f32 %v911_v61 }
 0x72a   :  { %vm762_vm5 = vmor %vm760_vm4, %vm761_vm3 }
 0x72b   :  { %v756_v63 = vmul.f32 %v911_v61, %v755_v62 }
 0x72d   :  { %v757_v0 = vmul.f32 0.5, %v756_v63 }
 0x72f   :  { %v758_v1 = vsub.f32 1.5, %v757_v0 }
 0x731   :  { %v759_v2 = vmul.f32 %v911_v61, %v758_v1 }
 0x733   :  { %v763_v7 = vsel %vm762_vm5, %v911_v61, %v759_v2 }
 0x734   :  { %v767_v8 = vmul.f32 %v763_v7, %v752_v3  ;;  %v766_v9 = vmul.f32 %v763_v7, %v751_v17  ;;  %v764_v11 = vmul.f32 %v763_v7, %v749_v5  ;;  %v765_v12 = vmul.f32 %v763_v7, %v750_v6 }
 0x736   :  { %v774_v14 = vmul.f32 %v886_v4, %v767_v8  ;;  %v773_v21 = vmul.f32 %v886_v4, %v766_v9  ;;  %v771_v22 = vmul.f32 %v886_v4, %v764_v11  ;;  %v772_v23 = vmul.f32 %v886_v4, %v765_v12 }
 0x738   :  { %v780_v24 = vadd.f32 %v887_v10, %v773_v21  ;;  %v781_v25 = vadd.f32 %v887_v10, %v774_v14  ;;  %v778_v26 = vadd.f32 %v887_v10, %v771_v22  ;;  %v779_v18 = vadd.f32 %v887_v10, %v772_v23 }
 0x73a   :  { %v785_v15 = vadd.f32 %v780_v24, %v1222_v50  ;;  %v786_v13 = vadd.f32 %v781_v25, %v1224_v51  ;;  %v783_v28 = vadd.f32 %v778_v26, %v1226_v41  ;;  %v784_v29 = vadd.f32 %v779_v18, %v1228_v36 }
 0x73c   :  { %v788_v27 = vpack.c.bf16 %v786_v13, %v785_v15  ;;  %v787_v19 = vpack.c.bf16 %v784_v29, %v783_v28 }
 0x73e   :  { %798 = vmatpush.bf16.msra.mxu2 %v788_v27 }
 0x742   :  { %799 = vmatpush.bf16.msra.mxu2 %v787_v19 }
 0x745   :  { %861 = vmatmul.msk.bf16.vlgmr.msra.gmra.mxu2 %vm185_vm2, %v782_v16 }
 0x7c8   :  { %v801_v50 = vpop.f32.mrf.mxu2 }
 0x7c9   :  { %806 = vst.msk [vmem:[#allocation10] sm:$0x3] %vm805_vm6, %v801_v50 }
 0x7ca   :  { %817 = dma.vmem_to_hbm [thread:$0]  %s813_s1, 32, %s815_s23, [#allocation4]  }
 0x7d0   :  { %v803_v51 = vpop.f32.mrf.mxu2 }
 0x7d1   :  { %1038 = dma.done.wait [#allocation4], 32  }
 0x7d2   :  { %1039 = vsyncadd [#allocation4], 4294967264 }
 0x7d3   :  { %822 = vsyncpa [#allocation3], 1 }
 0x7d4   :  { %823 = vsyncpa [#allocation6], 1 }
 0x7d5   :  { %824 = vsyncpa [#allocation9], 1 }
 0x7d6   :  { %825 = vsyncpa [#allocation4], 1 }

</bundles_post_ra>
